<compile_context>
chip_gen: v6e
topology: v6e:2x2x1
jax: 0.10.0
libtpu: 0.0.40
codegen_flags: <defaults>
</compile_context>

<pallas_src>
import jax
import jax.numpy as jnp
from jax.experimental import pallas as pl
from jax.experimental.pallas import tpu as pltpu


def _normalize_kernel(x_ref, mean_ref, inv_ref, o_ref):
    # x_ref/o_ref: (TR, TL) tile; mean_ref/inv_ref: (TR, 1) f32 columns.
    x = x_ref[...]
    cdt = jnp.bfloat16 if x.dtype == jnp.bfloat16 else jnp.float32
    mean = mean_ref[...].astype(cdt)
    inv = inv_ref[...].astype(cdt)
    o_ref[...] = ((x.astype(cdt) - mean) * inv).astype(o_ref.dtype)


def _round_up(x, m):
    return ((x + m - 1) // m) * m


def _round_down(x, m):
    return (x // m) * m


def normalize_layer(x, means, sds):
    """(x - mean_c) / sd_c applied per channel of an NCHW batch."""
    B, C, H, W = x.shape
    R, L = B * C, H * W
    itemsize = x.dtype.itemsize

    # Per-(batch, channel) statistic columns in f32; reciprocal computed once
    # here (B*C scalars, exact, negligible cost) instead of per tile in-kernel.
    mean_col = jnp.tile(means.astype(jnp.float32), B).reshape(R, 1)
    inv_col = (1.0 / sds.astype(jnp.float32))
    inv_col = jnp.tile(inv_col, B).reshape(R, 1)

    # Lane-dense layout: pad the spatial axis up to a multiple of 128 so every
    # store is an unmasked full-lane vst (no-op for 32x32 / 224x224 etc.).
    L_pad = _round_up(L, 128)
    x2d = x.reshape(R, L)
    if L_pad != L:
        x2d = jnp.pad(x2d, ((0, 0), (0, L_pad - L)))

    # Tile selection: maximize TL (whole padded spatial extent when it fits a
    # ~4 MiB tile at the minimum row count), shrink TR instead.  Row alignment
    # is dtype-aware so packed-sublane dtypes stay unmasked.
    row_align = max(8, 32 // itemsize)          # 8 f32, 16 bf16, 32 int8
    target_bytes = 4 << 20                      # ~4 MiB per tile
    max_tl = max(128, _round_down(target_bytes // (row_align * itemsize), 128))
    TL = L_pad if L_pad <= max_tl else max_tl

    tr_target = max(1, target_bytes // (TL * itemsize))
    if R <= tr_target:
        TR = R                                  # full dim => no alignment needed
    else:
        TR = max(row_align, _round_down(tr_target, row_align))

    # v7x has 2 TensorCores: avoid a degenerate (1,1) grid when there is
    # enough work to split along the row axis.
    if pl.cdiv(R, TR) * pl.cdiv(L_pad, TL) == 1 and R > row_align:
        TR = max(row_align, _round_up(pl.cdiv(R, 2), row_align))

    grid = (pl.cdiv(R, TR), pl.cdiv(L_pad, TL))

    # VMEM: 2x double-buffered input + output tiles, plus lane-padded (TR,128)
    # stat-column buffers (2 stats x 2 buffers), plus headroom for Mosaic
    # scratch.  Capped well under v7x's 64 MiB physical VMEM.
    tile_bytes = TR * TL * itemsize
    stat_block_bytes = TR * 128 * 4             # (TR,1) f32 column, lane-padded
    vmem_budget = min(4 * tile_bytes + 4 * stat_block_bytes + (4 << 20), 40 << 20)

    bytes_accessed = 2 * R * L * itemsize + 2 * R * 4
    cost = pl.CostEstimate(flops=2 * R * L, transcendentals=0,
                           bytes_accessed=bytes_accessed)

    out2d = pl.pallas_call(
        _normalize_kernel,
        out_shape=jax.ShapeDtypeStruct((R, L_pad), x.dtype),
        grid=grid,
        in_specs=[
            pl.BlockSpec((TR, TL), lambda i, j: (i, j)),
            pl.BlockSpec((TR, 1), lambda i, j: (i, 0)),
            pl.BlockSpec((TR, 1), lambda i, j: (i, 0)),
        ],
        out_specs=pl.BlockSpec((TR, TL), lambda i, j: (i, j)),
        compiler_params=pltpu.CompilerParams(
            dimension_semantics=("parallel", "parallel"),
            vmem_limit_bytes=vmem_budget,
        ),
        cost_estimate=cost,
    )(x2d, mean_col, inv_col)

    if L_pad != L:
        out2d = out2d[:, :L]
    return out2d.reshape(B, C, H, W)


if __name__ == "__main__":
    # Deterministic "dataset statistics" (module __init__ args), 4 channels.
    means = jnp.array([0.485, 0.456, 0.406, 0.5], dtype=jnp.float32)
    sds = jnp.array([0.229, 0.224, 0.225, 0.25], dtype=jnp.float32)

    key = jax.random.PRNGKey(0)
    x = jax.random.normal(key, (2, 4, 16, 16), dtype=jnp.float32)  # NCHW

    out = normalize_layer(x, means, sds)
    out = jax.block_until_ready(out)

    # Reference (pure JAX) check of the PyTorch semantics.
    ref = (x - means[None, :, None, None]) / sds[None, :, None, None]
    assert out.shape == x.shape and out.dtype == x.dtype
    # reciprocal-then-multiply vs divide differs by a couple of ulps.
    assert jnp.allclose(out, ref, atol=1e-6, rtol=1e-5)

    print("KERNEL_OK")
</pallas_src>

<mosaic_0001>
module attributes {stable_mosaic.version = 11 : i64} {
  func.func @_normalize_kernel(%arg0: i32, %arg1: i32, %arg2: memref<8x256xf32, #tpu.memory_space<vmem>>, %arg3: memref<8x1xf32, #tpu.memory_space<vmem>>, %arg4: memref<8x1xf32, #tpu.memory_space<vmem>>, %arg5: memref<8x256xf32, #tpu.memory_space<vmem>>) attributes {dimension_semantics = [#tpu.dimension_semantics<parallel>, #tpu.dimension_semantics<parallel>], iteration_bounds = array<i64: 1, 1>, scalar_prefetch = 0 : i64, scratch_operands = 0 : i64, tpu.core_type = #tpu.core_type<tc>, window_params = [{transform_indices = @transform_0, window_bounds = array<i64: 8, 256>}, {transform_indices = @transform_1, window_bounds = array<i64: 8, 1>}, {transform_indices = @transform_2, window_bounds = array<i64: 8, 1>}, {transform_indices = @transform_3, window_bounds = array<i64: 8, 256>}]} {
    %c0 = arith.constant 0 : index
    %c0_0 = arith.constant 0 : index
    %0 = vector.load %arg2[%c0, %c0_0] : memref<8x256xf32, #tpu.memory_space<vmem>>, vector<8x256xf32>
    %c0_1 = arith.constant 0 : index
    %c0_2 = arith.constant 0 : index
    %1 = vector.load %arg3[%c0_1, %c0_2] : memref<8x1xf32, #tpu.memory_space<vmem>>, vector<8x1xf32>
    %c0_3 = arith.constant 0 : index
    %c0_4 = arith.constant 0 : index
    %2 = vector.load %arg4[%c0_3, %c0_4] : memref<8x1xf32, #tpu.memory_space<vmem>>, vector<8x1xf32>
    %3 = vector.broadcast %1 : vector<8x1xf32> to vector<8x256xf32>
    %4 = arith.subf %0, %3 : vector<8x256xf32>
    %5 = vector.broadcast %2 : vector<8x1xf32> to vector<8x256xf32>
    %6 = arith.mulf %4, %5 : vector<8x256xf32>
    %c0_5 = arith.constant 0 : index
    %c0_6 = arith.constant 0 : index
    %7 = vector.load %arg5[%c0_5, %c0_6] : memref<8x256xf32, #tpu.memory_space<vmem>>, vector<8x256xf32>
    tpu.vector_store %arg5[%c0_5, %c0_6], %6 {strides = array<i32>} : memref<8x256xf32, #tpu.memory_space<vmem>>, vector<8x256xf32>,
    return
  }
  func.func @transform_0(%arg0: i32, %arg1: i32) -> (i32, i32) {
    %c0_i32 = arith.constant 0 : i32
    return %arg0, %arg1 : i32, i32
  }
  func.func @transform_1(%arg0: i32, %arg1: i32) -> (i32, i32) {
    %c0_i32 = arith.constant 0 : i32
    %c0_i32_0 = arith.constant 0 : i32
    return %arg0, %c0_i32 : i32, i32
  }
  func.func @transform_2(%arg0: i32, %arg1: i32) -> (i32, i32) {
    %c0_i32 = arith.constant 0 : i32
    %c0_i32_0 = arith.constant 0 : i32
    return %arg0, %c0_i32 : i32, i32
  }
  func.func @transform_3(%arg0: i32, %arg1: i32) -> (i32, i32) {
    %c0_i32 = arith.constant 0 : i32
    return %arg0, %arg1 : i32, i32
  }
}

</mosaic_0001>

<bundles_post_ra>
// kernel: tpu_custom_call.1
= control target key start
LH: loop header
LB: loop body
LE: loop exit
PB: predicated region body
PF: predicated region fallthrough
CT: control target
= control target key end

     0   :  { %v74_v1 = vmov 0   ;;  %s111_s0 = inlined_call_operand.vmem [shape: f32[8,256], index: 0, kind: input, shape index: {}]   ;;  %s112_s1 = inlined_call_operand.vmem [shape: f32[8,1], index: 1, kind: input, shape index: {}]   ;;  %s113_s2 = inlined_call_operand.vmem [shape: f32[8,1], index: 2, kind: input, shape index: {}]   ;;  %s114_s3 = inlined_call_operand.hbm [shape: f32[8,256], index: 3, kind: output, shape index: {}]  }
   0x1   :  { %v17_v0 = vld [vmem:[%s112_s1] sm:$0xff]  ;;  %51 = vset.pattern.permute.xlu0 %v74_v1 }
   0x2   :  { %8 = vsyncpa [#allocation3], 0  ;;  %21 = vperm.xlu0 %51, %v17_v0   ;;  %v18_v2 = vld [vmem:[%s113_s2] sm:$0xff]  ;;  %v16_v5 = vld [vmem:[%s111_s0 + $0x8] sm:$0xff]  ;;  %s75_s20 = smov [#allocation2]  }
   0x3   :  { %v15_v4 = vld [vmem:[%s111_s0] sm:$0xff]  ;;  %s41_s1 = sshll.u32 %s75_s20, 4  ;;  %s42_s1 = int_to_ptr.vmem [resolvable:$true] %s41_s1 }
   0x4   :  { %s52_s2 = scalar_lea.vmem %s42_s1, 256  ;;  %p57_p1 = scmp.lt.s32.totalorder %s42_s1, %s42_s1 }
   0x5   :  { %p53_p0 = scmp.ne.s32.totalorder %s42_s1, %s52_s2  ;;  %p58_p2 = scmp.lt.s32.totalorder %s52_s2, %s52_s2 }
   0x6   :  { %28 = vperm.xlu0 %51, %v18_v2  }
   0x7   :  { %p59_p3 = por %p58_p2, %p57_p1 }
   0x9   :  { %p60_p4 = pnand %p59_p3, %p53_p0 }
  0x7d   :  { %v22_v3 = vpop.permute.xlu0 %21 }
  0x7e   :  { %v24_v6 = vsub.f32 %v15_v4, %v22_v3  ;;  %v25_v7 = vsub.f32 %v16_v5, %v22_v3 }
  0x81   :  { %v29_v8 = vpop.permute.xlu0 %28 }
  0x82   :  { %v31_v9 = vmul.f32 %v29_v8, %v24_v6  ;;  %v32_v10 = vmul.f32 %v29_v8, %v25_v7 }
  0x84   :  { %33 = vst [vmem:[#allocation2] sm:$0xff] %v31_v9  ;;  %34 = vst [vmem:[#allocation2 + $0x8] sm:$0xff] %v32_v10 }
  0x85   :  { %63 = shalt.err (!%p60_p4)
}
  0x86   :  { %44 = dma.vmem_to_hbm [thread:$0]  %s42_s1, 256, %s114_s3, [#allocation3]  }
  0x87   :  { %72 = dma.done.wait [#allocation3], 256  }
  0x88   :  { %73 = vsyncadd [#allocation3], 4294967040 }
  0x89   :  { %48 = vsyncpa [#allocation3], 1 }

</bundles_post_ra>
